<compile_context>
chip_gen: v7x
topology: tpu7x:2x2x1
jax: 0.10.0
libtpu: 0.0.40
codegen_flags: <defaults>
</compile_context>

<pallas_src>
import functools
import math

import jax
import jax.numpy as jnp
import numpy as np
from jax import lax
from jax.experimental import pallas as pl
from jax.experimental.pallas import tpu as pltpu


def _vmem_budget_bytes():
    """Generation-aware VMEM budget: ~75% of physical (v5e/v6e: 128 MiB, v7x: 64 MiB)."""
    try:
        cap = int(pltpu.get_tpu_info().vmem_capacity_bytes)
        return max(cap * 3 // 4, 32 * 1024 * 1024)
    except Exception:
        return 48 * 1024 * 1024  # safe on every generation (fits v7x's 64 MiB with headroom)


# ----------------- kernel 1: fused QKV proj + attention + out-proj -----------------

def _attention_block_kernel(x_ref, wqkv_ref, bqkv_ref, wo_ref, bo_ref, o_ref,
                            *, num_heads, scale):
    # x_ref    : (S, D)   rows [b*S, (b+1)*S) of the flat (S*B, D) activation ("group" b)
    # wqkv_ref : (D, 3D)  [Wq^T | Wk^T | Wv^T]   (VMEM-resident across the grid)
    # bqkv_ref : (1, 3D)  f32
    # wo_ref   : (D, D)   Wo^T                    (VMEM-resident across the grid)
    # bo_ref   : (1, D)   f32
    # o_ref    : (S, D)   this group's lane-dense column slab of the (S, B*D) output
    _, d_model = x_ref.shape
    d_k = d_model // num_heads

    w_qkv = wqkv_ref[...]
    mxu = w_qkv.dtype                       # MXU operand dtype (bf16 fast path or f32)

    # Single fused QKV matmul (D-wide contraction), f32 accumulation + f32 bias.
    qkv = jnp.dot(x_ref[...].astype(mxu), w_qkv,
                  preferred_element_type=jnp.float32) + bqkv_ref[...]
    w_o = wo_ref[...]

    # Per-head attention.  The output projection is accumulated head-by-head
    # (attn @ Wo^T == sum_h attn_h @ Wo^T[h*d_k:(h+1)*d_k, :]) so there is no lane-dim
    # concatenate and only one (S, D) f32 accumulator stays live.
    acc = jnp.zeros(o_ref.shape, jnp.float32)
    for h in range(num_heads):
        lo = h * d_k
        qh = qkv[:, lo:lo + d_k] * scale                                # scale on (S, d_k)
        kh = qkv[:, d_model + lo:d_model + lo + d_k]
        vh = qkv[:, 2 * d_model + lo:2 * d_model + lo + d_k]
        # scores = (qh*scale) @ kh^T  (contract on d_k, no explicit transpose)
        sc = lax.dot_general(qh.astype(mxu), kh.astype(mxu),
                             (((1,), (1,)), ((), ())),
                             preferred_element_type=jnp.float32)
        # TODO(synk): mask != None path (masked_fill(mask == 1, -inf)) not implemented.
        sc = sc - jnp.max(sc, axis=-1, keepdims=True)
        p = jnp.exp(sc)
        inv = pl.reciprocal(jnp.sum(p, axis=-1, keepdims=True), approx=False)  # EUP
        # normalize the small (S, d_k) PV result rather than the (S, S) probabilities
        pv = jnp.dot(p.astype(mxu), vh.astype(mxu),
                     preferred_element_type=jnp.float32) * inv
        acc = acc + jnp.dot(pv.astype(mxu), w_o[lo:lo + d_k, :],
                            preferred_element_type=jnp.float32)
    o_ref[...] = (acc + bo_ref[...]).astype(o_ref.dtype)


# ---------- kernel 2: residual + LN1 + FFN(W1, ReLU, W2) + residual + LN2 ----------

def _ln_ffn_ln_kernel(x_ref, a_ref, vec_ref, b1_ref, w1_ref, w2_ref, o_ref, *, eps):
    # x_ref/a_ref/o_ref : (TM, D) row tiles
    # vec_ref           : (5, D)  packed [gamma1, beta1, b2, gamma2, beta2]  (resident)
    # b1_ref            : (1, F)  f32
    # w1_ref            : (D, F)  W1^T (resident);  w2_ref : (F, D) W2^T (resident)
    def layernorm(val, g, b):
        mu = jnp.mean(val, axis=-1, keepdims=True)
        c = val - mu
        var = jnp.mean(c * c, axis=-1, keepdims=True)   # biased variance (torch LayerNorm)
        return c * lax.rsqrt(var + eps) * g + b

    vec = vec_ref[...]
    g1, be1, b2, g2, be2 = vec[0:1], vec[1:2], vec[2:3], vec[3:4], vec[4:5]

    # dropout == identity at inference
    h1 = layernorm(x_ref[...] + a_ref[...], g1, be1)

    w1 = w1_ref[...]
    hid = jnp.dot(h1.astype(w1.dtype), w1,
                  preferred_element_type=jnp.float32) + b1_ref[...]
    hid = jnp.maximum(hid, 0.0)
    w2 = w2_ref[...]
    ff = jnp.dot(hid.astype(w2.dtype), w2, preferred_element_type=jnp.float32) + b2

    o_ref[...] = layernorm(h1 + ff, g2, be2).astype(o_ref.dtype)


def _pick_row_tile(n_rows, d_model, d_ff, w_itemsize, budget_bytes):
    """Largest row tile (dividing n_rows) whose kernel-2 VMEM footprint fits the budget."""
    # resident weights (double-buffered by the pipeline) + small resident vectors + slack
    fixed = 2 * (2 * d_model * d_ff * w_itemsize + d_ff * 4 + 8 * d_model * 4) + (2 << 20)
    # double-buffered (TM, D) streams for x / attn / out  +  (TM, F) f32 hidden (w/ headroom)
    per_row = 6 * d_model * 4 + 2 * d_ff * 4
    divisors = [c for c in (2048, 1024, 512, 256, 128, 64, 32, 16, 8) if n_rows % c == 0]
    for tm in divisors:
        if fixed + tm * per_row <= budget_bytes:
            return tm
    return divisors[-1] if divisors else n_rows


# ------------------------------ EncoderLayer forward -------------------------------

def encoder_layer(x, params, num_heads, eps=1e-5, mxu_dtype=jnp.bfloat16):
    """Pallas forward pass.  x: (S, B, D) float32, sequence-first like the torch module.

    mxu_dtype: dtype of the matmul operands (weights + activations fed to the MXU);
    accumulation is always float32.  bfloat16 is the fast path on v5e/v6e/v7x,
    jnp.float32 gives bit-faithful f32 math.
    """
    S, B, D = x.shape
    H = num_heads
    assert D % H == 0, "d_model must be divisible by num_heads"
    d_k = D // H
    N = S * B
    F = params["W1"].shape[0]
    assert S % 8 == 0 or B == 1, (
        "sequence length must be a multiple of 8 (sublane tiling of the per-group block)")

    vmem_budget = _vmem_budget_bytes()
    x2 = x.reshape(N, D)

    # ---- kernel 1: fused QKV projection + all heads of SDPA + output projection ----
    # Fused QKV weight: y = x @ [Wq^T | Wk^T | Wv^T] + [bq | bk | bv]
    wqkv = jnp.concatenate([params["Wq"].T, params["Wk"].T, params["Wv"].T],
                           axis=1).astype(mxu_dtype)
    bqkv = jnp.concatenate([params["bq"], params["bk"], params["bv"]]).reshape(1, 3 * D)
    wo_t = params["Wo"].T.astype(mxu_dtype)
    bo = params["bo"].reshape(1, D)

    attn_kernel = functools.partial(
        _attention_block_kernel, num_heads=H, scale=1.0 / math.sqrt(d_k))

    in_specs_1 = [
        pl.BlockSpec((S, D), lambda i: (i, 0)),        # x rows of group i
        pl.BlockSpec((D, 3 * D), lambda i: (0, 0)),    # Wqkv (resident)
        pl.BlockSpec((1, 3 * D), lambda i: (0, 0)),    # bqkv
        pl.BlockSpec((D, D), lambda i: (0, 0)),        # Wo^T (resident)
        pl.BlockSpec((1, D), lambda i: (0, 0)),        # bo
    ]
    cp1 = pltpu.CompilerParams(dimension_semantics=("parallel",),
                               vmem_limit_bytes=vmem_budget)

    # Output layout: when D % 128 == 0 (or B == 1) each group writes a lane-dense (S, D)
    # column slab of an (S, B*D) array; reshaping that slab to (S*B, D) is a free row-major
    # reshape that lands directly in the positional (s, b) order the torch module produces
    # after its transpose/view/swapaxes — no inter-kernel transpose, unmasked lane-dense
    # stores.  Otherwise fall back to the group-major layout + swapaxes.
    lane_dense = (D % 128 == 0) or (B == 1)
    if lane_dense:
        attn_slab = pl.pallas_call(
            attn_kernel,
            out_shape=jax.ShapeDtypeStruct((S, B * D), x.dtype),
            grid=(B,),
            in_specs=in_specs_1,
            out_specs=pl.BlockSpec((S, D), lambda i: (0, i)),
            compiler_params=cp1,
        )(x2, wqkv, bqkv, wo_t, bo)
        attn_m = attn_slab.reshape(N, D)               # free reshape, already positional
    else:
        attn_g = pl.pallas_call(
            attn_kernel,
            out_shape=jax.ShapeDtypeStruct((B * S, D), x.dtype),
            grid=(B,),
            in_specs=in_specs_1,
            out_specs=pl.BlockSpec((S, D), lambda i: (i, 0)),
            compiler_params=cp1,
        )(x2, wqkv, bqkv, wo_t, bo)
        # group-major -> positional reordering (only when D is not a multiple of 128)
        attn_m = jnp.swapaxes(attn_g.reshape(B, S, D), 0, 1).reshape(N, D)

    # ---- kernel 2: residual + LN1 + FFN (hidden stays in VMEM) + residual + LN2 ----
    w1_t = params["W1"].T.astype(mxu_dtype)            # (D, F)
    w2_t = params["W2"].T.astype(mxu_dtype)            # (F, D)
    b1 = params["b1"].reshape(1, F)
    # pack the five (D,)-sized LN/bias vectors into one resident block (one DMA, not five)
    vec = jnp.stack([params["g1"], params["be1"], params["b2"],
                     params["g2"], params["be2"]], axis=0)          # (5, D) f32

    tm = _pick_row_tile(N, D, F, jnp.dtype(mxu_dtype).itemsize, vmem_budget)
    row_spec = pl.BlockSpec((tm, D), lambda i: (i, 0))

    out = pl.pallas_call(
        functools.partial(_ln_ffn_ln_kernel, eps=eps),
        out_shape=jax.ShapeDtypeStruct((N, D), x.dtype),
        grid=(N // tm,),
        in_specs=[
            row_spec,                                   # x
            row_spec,                                   # attention output (positional order)
            pl.BlockSpec((5, D), lambda i: (0, 0)),     # packed [g1, be1, b2, g2, be2]
            pl.BlockSpec((1, F), lambda i: (0, 0)),     # b1
            pl.BlockSpec((D, F), lambda i: (0, 0)),     # W1^T (resident)
            pl.BlockSpec((F, D), lambda i: (0, 0)),     # W2^T (resident)
        ],
        out_specs=row_spec,
        compiler_params=pltpu.CompilerParams(
            dimension_semantics=("parallel",),
            vmem_limit_bytes=vmem_budget),
    )(x2, attn_m, vec, b1, w1_t, w2_t)

    return out.reshape(S, B, D)


# ------------------------------- pure-JAX reference --------------------------------

def reference(x, params, num_heads):
    S, B, D = x.shape
    H = num_heads
    dk = D // H
    PREC = lax.Precision.HIGHEST

    def lin(t, w, b):
        return jnp.dot(t, w.T, precision=PREC) + b

    def ln(v, g, b, eps=1e-5):
        m = v.mean(-1, keepdims=True)
        c = v - m
        var = (c * c).mean(-1, keepdims=True)
        return c * lax.rsqrt(var + eps) * g + b

    q = lin(x, params["Wq"], params["bq"]).reshape(B, S, H, dk).transpose(0, 2, 1, 3)
    k = lin(x, params["Wk"], params["bk"]).reshape(B, S, H, dk).transpose(0, 2, 1, 3)
    v = lin(x, params["Wv"], params["bv"]).reshape(B, S, H, dk).transpose(0, 2, 1, 3)
    s = jnp.einsum("bhqd,bhkd->bhqk", q, k, precision=PREC) / math.sqrt(dk)
    p = jax.nn.softmax(s, axis=-1)
    o = jnp.einsum("bhqk,bhkd->bhqd", p, v, precision=PREC)
    o = o.transpose(0, 2, 1, 3).reshape(B, S, D)
    o = jnp.swapaxes(o, 0, 1)
    o = lin(o, params["Wo"], params["bo"])
    h1 = ln(x + o, params["g1"], params["be1"])
    ff = lin(jnp.maximum(lin(h1, params["W1"], params["b1"]), 0.0),
             params["W2"], params["b2"])
    return ln(h1 + ff, params["g2"], params["be2"])


# -------------------------------- parameter init -----------------------------------

def init_params(key, d_model, d_ff):
    keys = jax.random.split(key, 16)

    def lin_init(kw, kb, dout, din):
        lim = 1.0 / math.sqrt(din)
        w = jax.random.uniform(kw, (dout, din), jnp.float32, -lim, lim)
        b = jax.random.uniform(kb, (dout,), jnp.float32, -lim, lim)
        return w, b

    p = {}
    p["Wq"], p["bq"] = lin_init(keys[0], keys[1], d_model, d_model)
    p["Wk"], p["bk"] = lin_init(keys[2], keys[3], d_model, d_model)
    p["Wv"], p["bv"] = lin_init(keys[4], keys[5], d_model, d_model)
    p["Wo"], p["bo"] = lin_init(keys[6], keys[7], d_model, d_model)
    p["W1"], p["b1"] = lin_init(keys[8], keys[9], d_ff, d_model)
    p["W2"], p["b2"] = lin_init(keys[10], keys[11], d_model, d_ff)
    p["g1"] = 1.0 + 0.1 * jax.random.normal(keys[12], (d_model,), jnp.float32)
    p["be1"] = 0.1 * jax.random.normal(keys[13], (d_model,), jnp.float32)
    p["g2"] = 1.0 + 0.1 * jax.random.normal(keys[14], (d_model,), jnp.float32)
    p["be2"] = 0.1 * jax.random.normal(keys[15], (d_model,), jnp.float32)
    return p


# -------------------------------------- main ----------------------------------------

if __name__ == "__main__":
    S, B, D, H, F = 8, 2, 128, 4, 256   # seq, batch, d_model, num_heads, d_ff

    key = jax.random.PRNGKey(0)
    kx, kp = jax.random.split(key)
    x = jax.random.normal(kx, (S, B, D), jnp.float32)
    params = init_params(kp, D, F)

    ref = reference(x, params, H)

    # exact f32 MXU-operand path: tight tolerance vs. the f32 reference
    out_f32 = jax.block_until_ready(encoder_layer(x, params, H, mxu_dtype=jnp.float32))
    assert out_f32.shape == (S, B, D)
    np.testing.assert_allclose(np.asarray(out_f32), np.asarray(ref), rtol=2e-3, atol=2e-3)

    # bf16 MXU-operand fast path (f32 accumulation) — the recommended config on v5e/v6e/v7x;
    # looser tolerance accounts for bf16 rounding of the matmul operands.
    out_bf16 = jax.block_until_ready(encoder_layer(x, params, H, mxu_dtype=jnp.bfloat16))
    np.testing.assert_allclose(np.asarray(out_bf16), np.asarray(ref), rtol=5e-2, atol=5e-2)

    print("KERNEL_OK")
</pallas_src>

<mosaic_0001>
module attributes {stable_mosaic.version = 11 : i64} {
  func.func @_attention_block_kernel(%arg0: i32, %arg1: memref<8x128xf32, #tpu.memory_space<vmem>>, %arg2: memref<128x384xf32, #tpu.memory_space<vmem>>, %arg3: memref<1x384xf32, #tpu.memory_space<vmem>>, %arg4: memref<128x128xf32, #tpu.memory_space<vmem>>, %arg5: memref<1x128xf32, #tpu.memory_space<vmem>>, %arg6: memref<8x128xf32, #tpu.memory_space<vmem>>) attributes {dimension_semantics = [#tpu.dimension_semantics<parallel>], iteration_bounds = array<i64: 2>, scalar_prefetch = 0 : i64, scratch_operands = 0 : i64, tpu.core_type = #tpu.core_type<tc>, window_params = [{transform_indices = @transform_0, window_bounds = array<i64: 8, 128>}, {pipeline_mode = #tpu.pipeline_mode<synchronous>, transform_indices = @transform_1, window_bounds = array<i64: 128, 384>}, {pipeline_mode = #tpu.pipeline_mode<synchronous>, transform_indices = @transform_2, window_bounds = array<i64: 1, 384>}, {pipeline_mode = #tpu.pipeline_mode<synchronous>, transform_indices = @transform_3, window_bounds = array<i64: 128, 128>}, {pipeline_mode = #tpu.pipeline_mode<synchronous>, transform_indices = @transform_4, window_bounds = array<i64: 1, 128>}, {transform_indices = @transform_5, window_bounds = array<i64: 8, 128>}]} {
    %c0 = arith.constant 0 : index
    %c0_0 = arith.constant 0 : index
    %0 = vector.load %arg2[%c0, %c0_0] : memref<128x384xf32, #tpu.memory_space<vmem>>, vector<128x384xf32>
    %c0_1 = arith.constant 0 : index
    %c0_2 = arith.constant 0 : index
    %1 = vector.load %arg1[%c0_1, %c0_2] : memref<8x128xf32, #tpu.memory_space<vmem>>, vector<8x128xf32>
    %cst = arith.constant dense<0.000000e+00> : vector<8x384xf32>
    %2 = tpu.matmul %1, %0, %cst {dimension_numbers = #tpu.dot_dimension_numbers<[1], [0], [0], [1], [0, 0, 1, 1], [], []>} : vector<8x128xf32>, vector<128x384xf32>, vector<8x384xf32> -> vector<8x384xf32>
    %c0_3 = arith.constant 0 : index
    %c0_4 = arith.constant 0 : index
    %3 = vector.load %arg3[%c0_3, %c0_4] : memref<1x384xf32, #tpu.memory_space<vmem>>, vector<1x384xf32>
    %4 = vector.broadcast %3 : vector<1x384xf32> to vector<8x384xf32>
    %5 = arith.addf %2, %4 : vector<8x384xf32>
    %c0_5 = arith.constant 0 : index
    %c0_6 = arith.constant 0 : index
    %6 = vector.load %arg4[%c0_5, %c0_6] : memref<128x128xf32, #tpu.memory_space<vmem>>, vector<128x128xf32>
    %cst_7 = arith.constant 0.000000e+00 : f32
    %7 = vector.broadcast %cst_7 : f32 to vector<8x128xf32>
    %8 = vector.extract_strided_slice %5 {offsets = [0, 0], sizes = [8, 32], strides = [1, 1]} : vector<8x384xf32> to vector<8x32xf32>
    %cst_8 = arith.constant 0.176776692 : f32
    %9 = vector.broadcast %cst_8 : f32 to vector<8x32xf32>
    %10 = arith.mulf %8, %9 : vector<8x32xf32>
    %11 = vector.extract_strided_slice %5 {offsets = [0, 128], sizes = [8, 32], strides = [1, 1]} : vector<8x384xf32> to vector<8x32xf32>
    %12 = vector.extract_strided_slice %5 {offsets = [0, 256], sizes = [8, 32], strides = [1, 1]} : vector<8x384xf32> to vector<8x32xf32>
    %cst_9 = arith.constant dense<0.000000e+00> : vector<8x8xf32>
    %13 = tpu.matmul %10, %11, %cst_9 {dimension_numbers = #tpu.dot_dimension_numbers<[1], [1], [0], [0], [0, 0, 1, 0], [], []>} : vector<8x32xf32>, vector<8x32xf32>, vector<8x8xf32> -> vector<8x8xf32>
    %cst_10 = arith.constant dense<0xFF800000> : vector<8xf32>
    %14 = vector.multi_reduction <maximumf>, %13, %cst_10 [1] : vector<8x8xf32> to vector<8xf32>
    %15 = vector.shape_cast %14 : vector<8xf32> to vector<8x1xf32>
    %16 = vector.broadcast %15 : vector<8x1xf32> to vector<8x8xf32>
    %17 = arith.subf %13, %16 : vector<8x8xf32>
    %18 = math.exp %17 : vector<8x8xf32>
    %cst_11 = arith.constant dense<0.000000e+00> : vector<8xf32>
    %19 = vector.multi_reduction <add>, %18, %cst_11 [1] : vector<8x8xf32> to vector<8xf32>
    %20 = vector.shape_cast %19 : vector<8xf32> to vector<8x1xf32>
    %21 = tpu.reciprocal %20 : vector<8x1xf32> -> vector<8x1xf32>
    %cst_12 = arith.constant dense<0.000000e+00> : vector<8x32xf32>
    %22 = tpu.matmul %18, %12, %cst_12 {dimension_numbers = #tpu.dot_dimension_numbers<[1], [0], [0], [1], [0, 0, 1, 1], [], []>} : vector<8x8xf32>, vector<8x32xf32>, vector<8x32xf32> -> vector<8x32xf32>
    %23 = vector.broadcast %21 : vector<8x1xf32> to vector<8x32xf32>
    %24 = arith.mulf %22, %23 : vector<8x32xf32>
    %25 = vector.extract_strided_slice %6 {offsets = [0, 0], sizes = [32, 128], strides = [1, 1]} : vector<128x128xf32> to vector<32x128xf32>
    %cst_13 = arith.constant dense<0.000000e+00> : vector<8x128xf32>
    %26 = tpu.matmul %24, %25, %cst_13 {dimension_numbers = #tpu.dot_dimension_numbers<[1], [0], [0], [1], [0, 0, 1, 1], [], []>} : vector<8x32xf32>, vector<32x128xf32>, vector<8x128xf32> -> vector<8x128xf32>
    %27 = arith.addf %7, %26 : vector<8x128xf32>
    %28 = vector.extract_strided_slice %5 {offsets = [0, 32], sizes = [8, 32], strides = [1, 1]} : vector<8x384xf32> to vector<8x32xf32>
    %cst_14 = arith.constant 0.176776692 : f32
    %29 = vector.broadcast %cst_14 : f32 to vector<8x32xf32>
    %30 = arith.mulf %28, %29 : vector<8x32xf32>
    %31 = vector.extract_strided_slice %5 {offsets = [0, 160], sizes = [8, 32], strides = [1, 1]} : vector<8x384xf32> to vector<8x32xf32>
    %32 = vector.extract_strided_slice %5 {offsets = [0, 288], sizes = [8, 32], strides = [1, 1]} : vector<8x384xf32> to vector<8x32xf32>
    %cst_15 = arith.constant dense<0.000000e+00> : vector<8x8xf32>
    %33 = tpu.matmul %30, %31, %cst_15 {dimension_numbers = #tpu.dot_dimension_numbers<[1], [1], [0], [0], [0, 0, 1, 0], [], []>} : vector<8x32xf32>, vector<8x32xf32>, vector<8x8xf32> -> vector<8x8xf32>
    %cst_16 = arith.constant dense<0xFF800000> : vector<8xf32>
    %34 = vector.multi_reduction <maximumf>, %33, %cst_16 [1] : vector<8x8xf32> to vector<8xf32>
    %35 = vector.shape_cast %34 : vector<8xf32> to vector<8x1xf32>
    %36 = vector.broadcast %35 : vector<8x1xf32> to vector<8x8xf32>
    %37 = arith.subf %33, %36 : vector<8x8xf32>
    %38 = math.exp %37 : vector<8x8xf32>
    %cst_17 = arith.constant dense<0.000000e+00> : vector<8xf32>
    %39 = vector.multi_reduction <add>, %38, %cst_17 [1] : vector<8x8xf32> to vector<8xf32>
    %40 = vector.shape_cast %39 : vector<8xf32> to vector<8x1xf32>
    %41 = tpu.reciprocal %40 : vector<8x1xf32> -> vector<8x1xf32>
    %cst_18 = arith.constant dense<0.000000e+00> : vector<8x32xf32>
    %42 = tpu.matmul %38, %32, %cst_18 {dimension_numbers = #tpu.dot_dimension_numbers<[1], [0], [0], [1], [0, 0, 1, 1], [], []>} : vector<8x8xf32>, vector<8x32xf32>, vector<8x32xf32> -> vector<8x32xf32>
    %43 = vector.broadcast %41 : vector<8x1xf32> to vector<8x32xf32>
    %44 = arith.mulf %42, %43 : vector<8x32xf32>
    %45 = vector.extract_strided_slice %6 {offsets = [32, 0], sizes = [32, 128], strides = [1, 1]} : vector<128x128xf32> to vector<32x128xf32>
    %cst_19 = arith.constant dense<0.000000e+00> : vector<8x128xf32>
    %46 = tpu.matmul %44, %45, %cst_19 {dimension_numbers = #tpu.dot_dimension_numbers<[1], [0], [0], [1], [0, 0, 1, 1], [], []>} : vector<8x32xf32>, vector<32x128xf32>, vector<8x128xf32> -> vector<8x128xf32>
    %47 = arith.addf %27, %46 : vector<8x128xf32>
    %48 = vector.extract_strided_slice %5 {offsets = [0, 64], sizes = [8, 32], strides = [1, 1]} : vector<8x384xf32> to vector<8x32xf32>
    %cst_20 = arith.constant 0.176776692 : f32
    %49 = vector.broadcast %cst_20 : f32 to vector<8x32xf32>
    %50 = arith.mulf %48, %49 : vector<8x32xf32>
    %51 = vector.extract_strided_slice %5 {offsets = [0, 192], sizes = [8, 32], strides = [1, 1]} : vector<8x384xf32> to vector<8x32xf32>
    %52 = vector.extract_strided_slice %5 {offsets = [0, 320], sizes = [8, 32], strides = [1, 1]} : vector<8x384xf32> to vector<8x32xf32>
    %cst_21 = arith.constant dense<0.000000e+00> : vector<8x8xf32>
    %53 = tpu.matmul %50, %51, %cst_21 {dimension_numbers = #tpu.dot_dimension_numbers<[1], [1], [0], [0], [0, 0, 1, 0], [], []>} : vector<8x32xf32>, vector<8x32xf32>, vector<8x8xf32> -> vector<8x8xf32>
    %cst_22 = arith.constant dense<0xFF800000> : vector<8xf32>
    %54 = vector.multi_reduction <maximumf>, %53, %cst_22 [1] : vector<8x8xf32> to vector<8xf32>
    %55 = vector.shape_cast %54 : vector<8xf32> to vector<8x1xf32>
    %56 = vector.broadcast %55 : vector<8x1xf32> to vector<8x8xf32>
    %57 = arith.subf %53, %56 : vector<8x8xf32>
    %58 = math.exp %57 : vector<8x8xf32>
    %cst_23 = arith.constant dense<0.000000e+00> : vector<8xf32>
    %59 = vector.multi_reduction <add>, %58, %cst_23 [1] : vector<8x8xf32> to vector<8xf32>
    %60 = vector.shape_cast %59 : vector<8xf32> to vector<8x1xf32>
    %61 = tpu.reciprocal %60 : vector<8x1xf32> -> vector<8x1xf32>
    %cst_24 = arith.constant dense<0.000000e+00> : vector<8x32xf32>
    %62 = tpu.matmul %58, %52, %cst_24 {dimension_numbers = #tpu.dot_dimension_numbers<[1], [0], [0], [1], [0, 0, 1, 1], [], []>} : vector<8x8xf32>, vector<8x32xf32>, vector<8x32xf32> -> vector<8x32xf32>
    %63 = vector.broadcast %61 : vector<8x1xf32> to vector<8x32xf32>
    %64 = arith.mulf %62, %63 : vector<8x32xf32>
    %65 = vector.extract_strided_slice %6 {offsets = [64, 0], sizes = [32, 128], strides = [1, 1]} : vector<128x128xf32> to vector<32x128xf32>
    %cst_25 = arith.constant dense<0.000000e+00> : vector<8x128xf32>
    %66 = tpu.matmul %64, %65, %cst_25 {dimension_numbers = #tpu.dot_dimension_numbers<[1], [0], [0], [1], [0, 0, 1, 1], [], []>} : vector<8x32xf32>, vector<32x128xf32>, vector<8x128xf32> -> vector<8x128xf32>
    %67 = arith.addf %47, %66 : vector<8x128xf32>
    %68 = vector.extract_strided_slice %5 {offsets = [0, 96], sizes = [8, 32], strides = [1, 1]} : vector<8x384xf32> to vector<8x32xf32>
    %cst_26 = arith.constant 0.176776692 : f32
    %69 = vector.broadcast %cst_26 : f32 to vector<8x32xf32>
    %70 = arith.mulf %68, %69 : vector<8x32xf32>
    %71 = vector.extract_strided_slice %5 {offsets = [0, 224], sizes = [8, 32], strides = [1, 1]} : vector<8x384xf32> to vector<8x32xf32>
    %72 = vector.extract_strided_slice %5 {offsets = [0, 352], sizes = [8, 32], strides = [1, 1]} : vector<8x384xf32> to vector<8x32xf32>
    %cst_27 = arith.constant dense<0.000000e+00> : vector<8x8xf32>
    %73 = tpu.matmul %70, %71, %cst_27 {dimension_numbers = #tpu.dot_dimension_numbers<[1], [1], [0], [0], [0, 0, 1, 0], [], []>} : vector<8x32xf32>, vector<8x32xf32>, vector<8x8xf32> -> vector<8x8xf32>
    %cst_28 = arith.constant dense<0xFF800000> : vector<8xf32>
    %74 = vector.multi_reduction <maximumf>, %73, %cst_28 [1] : vector<8x8xf32> to vector<8xf32>
    %75 = vector.shape_cast %74 : vector<8xf32> to vector<8x1xf32>
    %76 = vector.broadcast %75 : vector<8x1xf32> to vector<8x8xf32>
    %77 = arith.subf %73, %76 : vector<8x8xf32>
    %78 = math.exp %77 : vector<8x8xf32>
    %cst_29 = arith.constant dense<0.000000e+00> : vector<8xf32>
    %79 = vector.multi_reduction <add>, %78, %cst_29 [1] : vector<8x8xf32> to vector<8xf32>
    %80 = vector.shape_cast %79 : vector<8xf32> to vector<8x1xf32>
    %81 = tpu.reciprocal %80 : vector<8x1xf32> -> vector<8x1xf32>
    %cst_30 = arith.constant dense<0.000000e+00> : vector<8x32xf32>
    %82 = tpu.matmul %78, %72, %cst_30 {dimension_numbers = #tpu.dot_dimension_numbers<[1], [0], [0], [1], [0, 0, 1, 1], [], []>} : vector<8x8xf32>, vector<8x32xf32>, vector<8x32xf32> -> vector<8x32xf32>
    %83 = vector.broadcast %81 : vector<8x1xf32> to vector<8x32xf32>
    %84 = arith.mulf %82, %83 : vector<8x32xf32>
    %85 = vector.extract_strided_slice %6 {offsets = [96, 0], sizes = [32, 128], strides = [1, 1]} : vector<128x128xf32> to vector<32x128xf32>
    %cst_31 = arith.constant dense<0.000000e+00> : vector<8x128xf32>
    %86 = tpu.matmul %84, %85, %cst_31 {dimension_numbers = #tpu.dot_dimension_numbers<[1], [0], [0], [1], [0, 0, 1, 1], [], []>} : vector<8x32xf32>, vector<32x128xf32>, vector<8x128xf32> -> vector<8x128xf32>
    %87 = arith.addf %67, %86 : vector<8x128xf32>
    %c0_32 = arith.constant 0 : index
    %c0_33 = arith.constant 0 : index
    %88 = vector.load %arg5[%c0_32, %c0_33] : memref<1x128xf32, #tpu.memory_space<vmem>>, vector<1x128xf32>
    %89 = vector.broadcast %88 : vector<1x128xf32> to vector<8x128xf32>
    %90 = arith.addf %87, %89 : vector<8x128xf32>
    %c0_34 = arith.constant 0 : index
    %c0_35 = arith.constant 0 : index
    %91 = vector.load %arg6[%c0_34, %c0_35] : memref<8x128xf32, #tpu.memory_space<vmem>>, vector<8x128xf32>
    tpu.vector_store %arg6[%c0_34, %c0_35], %90 {strides = array<i32>} : memref<8x128xf32, #tpu.memory_space<vmem>>, vector<8x128xf32>,
    return
  }
  func.func @transform_0(%arg0: i32) -> (i32, i32) {
    %c0_i32 = arith.constant 0 : i32
    %c0_i32_0 = arith.constant 0 : i32
    return %arg0, %c0_i32 : i32, i32
  }
  func.func @transform_1(%arg0: i32) -> (i32, i32) {
    %c0_i32 = arith.constant 0 : i32
    %c0_i32_0 = arith.constant 0 : i32
    %c0_i32_1 = arith.constant 0 : i32
    return %c0_i32, %c0_i32_0 : i32, i32
  }
  func.func @transform_2(%arg0: i32) -> (i32, i32) {
    %c0_i32 = arith.constant 0 : i32
    %c0_i32_0 = arith.constant 0 : i32
    %c0_i32_1 = arith.constant 0 : i32
    return %c0_i32, %c0_i32_0 : i32, i32
  }
  func.func @transform_3(%arg0: i32) -> (i32, i32) {
    %c0_i32 = arith.constant 0 : i32
    %c0_i32_0 = arith.constant 0 : i32
    %c0_i32_1 = arith.constant 0 : i32
    return %c0_i32, %c0_i32_0 : i32, i32
  }
  func.func @transform_4(%arg0: i32) -> (i32, i32) {
    %c0_i32 = arith.constant 0 : i32
    %c0_i32_0 = arith.constant 0 : i32
    %c0_i32_1 = arith.constant 0 : i32
    return %c0_i32, %c0_i32_0 : i32, i32
  }
  func.func @transform_5(%arg0: i32) -> (i32, i32) {
    %c0_i32 = arith.constant 0 : i32
    %c0_i32_0 = arith.constant 0 : i32
    return %c0_i32, %arg0 : i32, i32
  }
}

</mosaic_0001>

<bundles_post_ra>
// kernel: tpu_custom_call.1
= control target key start
LH: loop header
LB: loop body
LE: loop exit
PB: predicated region body
PF: predicated region fallthrough
CT: control target
= control target key end

     0   :  { %10 = vsyncpa [#allocation3], 0  ;;  %s2472_s0 = inlined_call_operand.hbm [shape: f32[16,128], index: 0, kind: input, shape index: {}]   ;;  %s2473_s1 = inlined_call_operand.hbm [shape: f32[128,384], index: 1, kind: input, shape index: {}]   ;;  %s2474_s2 = inlined_call_operand.vmem [shape: f32[1,384], index: 2, kind: input, shape index: {}]   ;;  %s2475_s3 = inlined_call_operand.hbm [shape: f32[128,128], index: 3, kind: input, shape index: {}]   ;;  %s2476_s4 = inlined_call_operand.vmem [shape: f32[1,128], index: 4, kind: input, shape index: {}]   ;;  %s2477_s5 = inlined_call_operand.hbm [shape: f32[8,256], index: 5, kind: output, shape index: {}]  }
   0x1   :  { %12 = vsyncpa [#allocation3 + $0x1], 0 }
   0x2   :  { %13 = vsyncpa [#allocation6], 0 }
   0x3   :  { %14 = vsyncpa [#allocation4], 0 }
   0x4   :  { %16 = vsyncpa [#allocation4 + $0x1], 0  ;;  %s2137_s18 = smov 0   ;;  %s2139_s19 = smov 0  }
   0x5   :  { %s2141_s20 = smov 0   ;;  %s2143_s21 = smov 0  }
   0x6 LB: > { %s2158_s22 = sadd.s32 4294967295, %s2091_s21   ;;  %s1557_s23 = sadd.s32 4294967294, %s2091_s21   ;;  %s2091_s21 = sphi %s2143_s21, %s2497_s21   ;;  %s2087_s20 = sphi %s2141_s20, %s2496_s20   ;;  %s2083_s19 = sphi %s2139_s19, %s2495_s19   ;;  %s2079_s18 = sphi %s2137_s18, %s2494_s18  }
   0x7   : > { %p42_p0 = scmp.ne.s32.totalorder %s2083_s19, %s2079_s18  ;;  %p2478_p1 = scmp.eq.s32.totalorder %s2158_s22, 0 }
   0x8   : > { %p156_p3 = scmp.eq.s32.totalorder %s1557_s23, 1  ;;  %p1558_p5 = scmp.ge.s32.totalorder %s2091_s21, 1 }
   0x9   : > { %p2167_p4 = por %p2478_p1, %p42_p0  ;;  %p163_p7 = scmp.lt.s32.totalorder %s2091_s21, 3 }
   0xa   : > { %p2172_p6 = por %p156_p3, %p42_p0  ;;  %s2093_s27 = smov [#allocation5]  }
   0xb   : > { %s2481_s24 = scalar_select %p2167_p4, 1, 0 }
   0xc   : > { %s2482_s25 = scalar_select %p2172_p6, 1, 0 }
   0xd   : > { %p2177_p8 = pnand %p1558_p5, %p163_p7  ;;  %s175_s28 = sshll.u32 %s2093_s27, 4  ;;  %s2181_s28 = int_to_ptr.vmem [resolvable:$true] %s175_s28 }
   0xe   : > { %s2094_s30 = smov [#allocation7]   ;;  %s1935_s9 = scalar_lea.hbm %s2473_s1, 6144 }
   0xf   : > { %p1854_p9 = pneg %p2177_p8  ;;  %s191_s6 = sshll.u32 %s2094_s30, 4  ;;  %s2192_s6 = int_to_ptr.vmem [resolvable:$true] %s191_s6 }
  0x10   : > { %p1936_p12 = scmp.ne.s32.totalorder %s2473_s1, %s1935_s9  ;;  %p1942_p5 = scmp.lt.u32.totalorder %s1935_s9, %s2473_s1 }
  0x11   : > { %p2188_p11 = pnand %p1854_p9, %p2478_p1 }
  0x13   : > { %p1937_p13 = pneg %p2188_p11 }
  0x15   : > { %p1938_p0 = pnand %p1937_p13, %p1936_p12 }
  0x17   : > { %p1939_p3 = pneg %p1938_p0 }
  0x19   : > { %p1944_p7 = pnand %p1942_p5, %p1939_p3 }
  0x1b   : > { %1947 = shalt.err (!%p1944_p7)
}
  0x1c   : > { %s1948_s14 = scalar_lea.vmem %s2181_s28, 6144  ;;  %p1956_p2 = scmp.lt.s32.totalorder %s2181_s28, %s2181_s28 }
  0x1d   : > { %p1949_p9 = scmp.ne.s32.totalorder %s2181_s28, %s1948_s14  ;;  %p1957_p12 = scmp.lt.s32.totalorder %s1948_s14, %s1948_s14 }
  0x1f   : > { %p1951_p10 = pnand %p1949_p9, %p1937_p13  ;;  %p1958_p0 = por %p1957_p12, %p1956_p2 }
  0x21   : > { %p1952_p1 = pneg %p1951_p10 }
  0x23   : > { %p1959_p6 = pnand %p1958_p0, %p1952_p1 }
  0x25   : > { %1962 = shalt.err (!%p1959_p6)
}
  0x26   : > { %s2095_s15 = smov 384   ;;  %s2096_s16 = smov 24  }
  0x27   : > { %1857 = dma.hbm_to_vmem [thread:$0]  (!%p2188_p11), %s2473_s1, 6144, %s2181_s28, [#allocation6], %s2095_s15, %s2095_s15, %s2096_s16  }
  0x28   : > { %s1963_s7 = scalar_lea.hbm %s2475_s3, 2048 }
  0x29   : > { %p1964_p2 = scmp.ne.s32.totalorder %s2475_s3, %s1963_s7  ;;  %p1970_p10 = scmp.lt.u32.totalorder %s1963_s7, %s2475_s3 }
  0x2b   : > { %p1966_p1 = pnand %p1964_p2, %p1937_p13 }
  0x2d   : > { %p1967_p6 = pneg %p1966_p1 }
  0x2f   : > { %p1972_p3 = pnand %p1970_p10, %p1967_p6 }
  0x31   : > { %1975 = shalt.err (!%p1972_p3)
}
  0x32   : > { %s1976_s28 = scalar_lea.vmem %s2192_s6, 2048  ;;  %p1984_p12 = scmp.lt.s32.totalorder %s2192_s6, %s2192_s6 }
  0x33   : > { %p1977_p5 = scmp.ne.s32.totalorder %s2192_s6, %s1976_s28  ;;  %p1985_p0 = scmp.lt.s32.totalorder %s1976_s28, %s1976_s28 }
  0x35   : > { %p1979_p7 = pnand %p1977_p5, %p1937_p13  ;;  %p1986_p2 = por %p1985_p0, %p1984_p12 }
  0x37   : > { %p1980_p9 = pneg %p1979_p7 }
  0x39   : > { %p1987_p1 = pnand %p1986_p2, %p1980_p9 }
  0x3b   : > { %1990 = shalt.err (!%p1987_p1)
}
  0x3c   : > { %s2097_s12 = smov 128   ;;  %s2098_s13 = smov 8  }
  0x3d   : > { %1860 = dma.hbm_to_vmem [thread:$0]  (!%p2188_p11), %s2475_s3, 2048, %s2192_s6, [#allocation6], %s2097_s12, %s2097_s12, %s2098_s13  }
  0x3e   : > { %s2247_s16 = sadd.s32 1, %s2091_s21   ;;  %s29_s23 = sadd.s32 1, %s2087_s20 }
  0x3f   : > { %s26_s17 = ssub.s32 %s2091_s21, %s2247_s16  ;;  %p36_p6 = scmp.ne.s32.totalorder %s2087_s20, %s2083_s19 }
  0x40   : > { %p27_p13 = scmp.eq.s32.totalorder %s26_s17, 0  ;;  %p37_p10 = scmp.eq.s32.totalorder %s2091_s21, 0 }
  0x41   : > { %p2485_p5 = scmp.eq.s32.totalorder %s2158_s22, 1  ;;  %p1871_p9 = scmp.lt.s32.totalorder %s2091_s21, 2 }
  0x42   : > { %s2256_s27 = scalar_select %p27_p13, %s2087_s20, %s29_s23  }
  0x43   : > { %p38_p3 = por %p37_p10, %p36_p6  ;;  %p2260_p7 = por %p2485_p5, %p36_p6 }
  0x44   : > { %s208_s29 = sand.u32 1, %s2087_s20   ;;  %s1563_s6 = sshll.u32 %s2091_s21, 7 }
  0x45   : > { %s2486_s30 = scalar_select %p2260_p7, 1, 0 }
  0x46   : > { %s1562_s7 = sshll.u32 %s208_s29, 3  ;;  %s2270_s10 = scalar_lea.hbm %s2472_s0, %s1563_s6 }
  0x47   : > { %s212_s11 = scalar_lea.vmem [#allocation2], %s1562_s7  ;;  %p2274_p11 = pnand %p1871_p9, %p38_p3 }
  0x48   : > { %s219_s28 = sshll.u32 %s212_s11, 4  ;;  %s209_s13 = scalar_lea.sflag [#allocation3], %s208_s29  ;;  %s2272_s28 = int_to_ptr.vmem [resolvable:$true] %s219_s28 }
  0x49   : > { %s1991_s14 = scalar_lea.hbm %s2270_s10, 128  ;;  %p1993_p0 = pneg %p2274_p11 }
  0x4a   : > { %p1992_p12 = scmp.ne.s32.totalorder %s2270_s10, %s1991_s14  ;;  %s1996_s23 = scalar_lea.hbm %s2472_s0, 256 }
  0x4b   : > { %p1997_p13 = scmp.lt.u32.totalorder %s2270_s10, %s2472_s0  ;;  %p1998_p6 = scmp.lt.u32.totalorder %s1996_s23, %s1991_s14 }
  0x4c   : > { %p1994_p2 = pnand %p1993_p0, %p1992_p12  ;;  %p2000_p3 = scmp.lt.u32.totalorder %s1991_s14, %s2270_s10 }
  0x4d   : > { %p1999_p10 = por %p1998_p6, %p1997_p13 }
  0x4e   : > { %p1995_p1 = pneg %p1994_p2 }
  0x4f   : > { %p2001_p5 = por %p2000_p3, %p1999_p10 }
  0x51   : > { %p2002_p9 = pnand %p2001_p5, %p1995_p1 }
  0x53   : > { %2005 = shalt.err (!%p2002_p9)
}
  0x54   : > { %s2006_s29 = scalar_lea.vmem %s2272_s28, 128  ;;  %s2099_s8 = smov [#allocation2]  }
  0x55   : > { %p2007_p12 = scmp.ne.s32.totalorder %s2272_s28, %s2006_s29  ;;  %s2011_s9 = sshll.u32 %s2099_s8, 4  ;;  %s2012_s9 = int_to_ptr.vmem [resolvable:$false] %s2011_s9 }
  0x56   : > { %s2013_s11 = scalar_lea.vmem %s2012_s9, 256  ;;  %p2014_p4 = scmp.lt.s32.totalorder %s2272_s28, %s2012_s9 }
  0x57   : > { %p2009_p2 = pnand %p2007_p12, %p1993_p0  ;;  %p2015_p13 = scmp.lt.s32.totalorder %s2013_s11, %s2006_s29 }
  0x59   : > { %p2010_p7 = pneg %p2009_p2  ;;  %p2016_p6 = por %p2015_p13, %p2014_p4 }
  0x5b   : > { %p2017_p10 = pnand %p2016_p6, %p2010_p7 }
  0x5d   : > { %2020 = shalt.err (!%p2017_p10)
}
  0x5e   : > { %1864 = dma.hbm_to_vmem [thread:$0]  (!%p2274_p11), %s2270_s10, 128, %s2272_s28, %s209_s13  }
  0x5f   : > { %228 = sbr.rel (%p2177_p8) target bundleno = 2251 (0x8cb), region = 40  ;;  %s2306_s14 = sand.u32 (!%p2177_p8), 1, %s2083_s19  }
  0x60   : > { %s1565_s15 = sshll.u32 (!%p2177_p8), %s2306_s14, 3  ;;  %s231_s17 = scalar_lea.sflag (!%p2177_p8), [#allocation3], %s2306_s14 }
  0x61   : > { %s2312_s23 = scalar_lea.vmem (!%p2177_p8), [#allocation2], %s1565_s15  ;;  %p2488_p4 = scmp.ne.s32.totalorder (!%p2177_p8), %s2481_s24, 0 }
  0x66   : > { %2066 = dma.done.wait (%p2488_p4), %s231_s17, 128  }
  0x67   : > { %2068 = vsyncadd (%p2488_p4), %s231_s17, 4294967168  ;;  %p2489_p7 = scmp.eq.s32.totalorder %s2158_s22, 0 }
  0x69   : > { %2070 = dma.done.wait (%p2489_p7), [#allocation6], 8192   ;;  %p2490_p8 = pmov %p2489_p7 }
  0x6a   : > { %v2100_v0 = vmov 0.0|0.0   ;;  %v2101_v1 = vmov 0.0   ;;  %vm2102_vm0 = vmmov 0   ;;  %v270_v2 = vld [vmem:[#allocation5 + $0x8] sm:$0xff]  ;;  %v273_v3 = vld [vmem:[#allocation5 + $0x20] sm:$0xff]  ;;  %v272_v6 = vld [vmem:[#allocation5 + $0x18] sm:$0xff] }
  0x6b   : > { %2072 = vsyncadd (%p2490_p8), [#allocation6], 4294959104  ;;  %1794 = vmatprep.subr.bf16.mxu1 %v2100_v0  ;;  %399 = vmatprep.mubr.f32.mxu0 %v2101_v1  ;;  %v269_v4 = vld [vmem:[#allocation5] sm:$0xff]  ;;  %v1762_v5 = vpack.c.bf16 %v273_v3, %v270_v2  ;;  %v276_v7 = vld [vmem:[#allocation5 + $0x38] sm:$0xff]  ;;  %vm493_vm1 = vcmask 261120   ;;  %s2103_s10 = smov 96  }
  0x6c   : > { %1675 = vmatprep.mubr.msk.f32.mxu1 %vm2102_vm0, %v2101_v1  ;;  %v279_v8 = vld [vmem:[#allocation5 + $0x50] sm:$0xff]  ;;  %v1764_v9 = vpack.c.bf16 %v272_v6, %v269_v4  ;;  %v278_v12 = vld [vmem:[#allocation5 + $0x48] sm:$0xff]  ;;  %v285_v14 = vld [vmem:[#allocation5 + $0x80] sm:$0xff]  ;;  %s2104_s28 = smov 64   ;;  %vm570_vm2 = vcmask 64512   ;;  %s2105_s12 = smov 32  }
  0x6d   : > { %v1766_v10 = vpack.c.bf16 %v279_v8, %v276_v7  ;;  %v275_v11 = vld [vmem:[#allocation5 + $0x30] sm:$0xff]  ;;  %v282_v13 = vld [vmem:[#allocation5 + $0x68] sm:$0xff]  ;;  %1763 = vmatprep.subr.bf16.mxu0 %v1762_v5  ;;  %v281_v19 = vld [vmem:[#allocation5 + $0x60] sm:$0xff]  ;;  %s1587_s6 = sshll.u32 %s2158_s22, 7  ;;  %s268_s29 = scalar_lea.vmem [#allocation8], %s1565_s15 }
  0x6e   : > { %1765 = vmatpush1.bf16.msra.mxu0 %v1764_v9  ;;  %v1768_v15 = vpack.c.bf16 %v278_v12, %v275_v11  ;;  %v271_v16 = vld [vmem:[#allocation5 + $0x10] sm:$0xff]  ;;  %v274_v17 = vld [vmem:[#allocation5 + $0x28] sm:$0xff]  ;;  %v1770_v18 = vpack.c.bf16 %v285_v14, %v282_v13  ;;  %v284_v20 = vld [vmem:[#allocation5 + $0x78] sm:$0xff]  ;;  %v320_v13 = vlaneseq  ;;  %s1468_s8 = sshll.u32 %s268_s29, 4  ;;  %s2428_s17 = scalar_lea.hbm %s2477_s5, %s1587_s6  ;;  %s2430_s8 = int_to_ptr.vmem [resolvable:$true] %s1468_s8 }
  0x6f   : > { %1767 = vmatprep.subr.bf16.mxu0 %v1766_v10  ;;  %v1795_v21 = vpack.c.bf16 %v274_v17, %v271_v16  ;;  %v288_v22 = vld [vmem:[#allocation5 + $0x98] sm:$0xff]  ;;  %v291_v23 = vld [vmem:[#allocation5 + $0xb0] sm:$0xff]  ;;  %v277_v24 = vld [vmem:[#allocation5 + $0x40] sm:$0xff]  ;;  %v1772_v27 = vpack.c.bf16 %v284_v20, %v281_v19  ;;  %s2021_s24 = scalar_lea.vmem %s2430_s8, 128  ;;  %p2491_p0 = scmp.ne.s32.totalorder %s2486_s30, 0 }
  0x70   : > { %v280_v25 = vld [vmem:[#allocation5 + $0x58] sm:$0xff]  ;;  %v283_v28 = vld [vmem:[#allocation5 + $0x70] sm:$0xff]  ;;  %v286_v29 = vld [vmem:[#allocation5 + $0x88] sm:$0xff]  ;;  %v1774_v30 = vpack.c.bf16 %v291_v23, %v288_v22  ;;  %v321_v14 = vshrl.u32 %v320_v13, 7  ;;  %p2022_p11 = scmp.ne.s32.totalorder %s2430_s8, %s2021_s24  ;;  %s2106_s22 = smov [#allocation8]  }
  0x71   : > { %1796 = vmatpush3.bf16.msra.mxu1 %v1795_v21  ;;  %v1798_v26 = vpack.c.bf16 %v280_v25, %v277_v24  ;;  %v287_v31 = vld [vmem:[#allocation5 + $0x90] sm:$0xff]  ;;  %v290_v32 = vld [vmem:[#allocation5 + $0xa8] sm:$0xff]  ;;  %v297_v34 = vld [vmem:[#allocation5 + $0xe0] sm:$0xff]  ;;  %v1801_v35 = vpack.c.bf16 %v286_v29, %v283_v28  ;;  %s2025_s15 = sshll.u32 %s2106_s22, 4  ;;  %s2026_s15 = int_to_ptr.vmem [resolvable:$false] %s2025_s15 }
  0x72   : > { %1769 = vmatpush1.bf16.msra.mxu0 %v1768_v15  ;;  %1797 = vmatprep.subr.bf16.mxu1 %v2100_v0  ;;  %v294_v33 = vld [vmem:[#allocation5 + $0xc8] sm:$0xff]  ;;  %v1776_v36 = vpack.c.bf16 %v290_v32, %v287_v31  ;;  %v289_v37 = vld [vmem:[#allocation5 + $0xa0] sm:$0xff]  ;;  %v292_v38 = vld [vmem:[#allocation5 + $0xb8] sm:$0xff]  ;;  %v322_v15 = vsub.s32 0, %v321_v14  ;;  %v326_v17 = vsub.s32 1, %v321_v14  ;;  %v330_v20 = vsub.s32 2, %v321_v14  ;;  %p2023_p1 = pnand %p2022_p11, %p2491_p0  ;;  %p2028_p5 = scmp.lt.s32.totalorder %s2430_s8, %s2026_s15 }
  0x73   : > { %1771 = vmatprep.subr.bf16.mxu0 %v1770_v18  ;;  %v1778_v39 = vpack.c.bf16 %v297_v34, %v294_v33  ;;  %v293_v40 = vld [vmem:[#allocation5 + $0xc0] sm:$0xff]  ;;  %v296_v41 = vld [vmem:[#allocation5 + $0xd8] sm:$0xff]  ;;  %v303_v43 = vld [vmem:[#allocation5 + $0x110] sm:$0xff]  ;;  %v1804_v44 = vpack.c.bf16 %v292_v38, %v289_v37  ;;  %s2027_s26 = scalar_lea.vmem %s2026_s15, 256 }
  0x74   : > { %v300_v42 = vld [vmem:[#allocation5 + $0xf8] sm:$0xff]  ;;  %v1780_v45 = vpack.c.bf16 %v296_v41, %v293_v40  ;;  %v295_v46 = vld [vmem:[#allocation5 + $0xd0] sm:$0xff]  ;;  %v298_v47 = vld [vmem:[#allocation5 + $0xe8] sm:$0xff]  ;;  %p2024_p3 = pneg %p2023_p1  ;;  %p2029_p9 = scmp.lt.s32.totalorder %s2027_s26, %s2021_s24 }
  0x75   : > { %1799 = vmatpush3.bf16.msra.mxu1 %v1798_v26  ;;  %v1782_v48 = vpack.c.bf16 %v303_v43, %v300_v42  ;;  %v299_v49 = vld [vmem:[#allocation5 + $0xf0] sm:$0xff]  ;;  %v302_v50 = vld [vmem:[#allocation5 + $0x108] sm:$0xff]  ;;  %v309_v52 = vld [vmem:[#allocation5 + $0x140] sm:$0xff]  ;;  %v1807_v53 = vpack.c.bf16 %v298_v47, %v295_v46 }
  0x76   : > { %1773 = vmatpush1.bf16.msra.mxu0 %v1772_v27  ;;  %1800 = vmatprep.subr.bf16.mxu1 %v2100_v0  ;;  %v306_v51 = vld [vmem:[#allocation5 + $0x128] sm:$0xff]  ;;  %v1784_v54 = vpack.c.bf16 %v302_v50, %v299_v49  ;;  %v301_v55 = vld [vmem:[#allocation5 + $0x100] sm:$0xff]  ;;  %v304_v56 = vld [vmem:[#allocation5 + $0x118] sm:$0xff]  ;;  %p2030_p12 = por %p2029_p9, %p2028_p5 }
  0x77   : > { %1775 = vmatprep.subr.bf16.mxu0 %v1774_v30  ;;  %v1786_v57 = vpack.c.bf16 %v309_v52, %v306_v51  ;;  %v305_v58 = vld [vmem:[#allocation5 + $0x120] sm:$0xff]  ;;  %v308_v59 = vld [vmem:[#allocation5 + $0x138] sm:$0xff]  ;;  %v315_v61 = vld [vmem:[#allocation5 + $0x170] sm:$0xff]  ;;  %v1810_v62 = vpack.c.bf16 %v304_v56, %v301_v55 }
  0x78   : > { %v312_v60 = vld [vmem:[#allocation5 + $0x158] sm:$0xff]  ;;  %v1788_v63 = vpack.c.bf16 %v308_v59, %v305_v58  ;;  %v307_v2 = vld [vmem:[#allocation5 + $0x130] sm:$0xff]  ;;  %v310_v3 = vld [vmem:[#allocation5 + $0x148] sm:$0xff]  ;;  %p2031_p2 = pnand %p2030_p12, %p2024_p3 }
  0x79   : > { %1802 = vmatpush3.bf16.msra.mxu1 %v1801_v35  ;;  %v1790_v4 = vpack.c.bf16 %v315_v61, %v312_v60  ;;  %v311_v5 = vld [vmem:[#allocation5 + $0x150] sm:$0xff]  ;;  %v314_v6 = vld [vmem:[#allocation5 + $0x168] sm:$0xff]  ;;  %v1813_v7 = vpack.c.bf16 %v310_v3, %v307_v2  ;;  %v313_v9 = vld [vmem:[#allocation5 + $0x160] sm:$0xff] }
  0x7a   : > { %1777 = vmatpush1.bf16.msra.mxu0 %v1776_v36  ;;  %1803 = vmatprep.subr.bf16.mxu1 %v2100_v0  ;;  %v1792_v8 = vpack.c.bf16 %v314_v6, %v311_v5  ;;  %v316_v10 = vld [vmem:[#allocation5 + $0x178] sm:$0xff]  ;;  %v318_v16 = vld [vmem:[%s2474_s2] sm:$0x7]  ;;  %v476_v47 = vld [vmem:[#allocation7] sm:$0xff] }
  0x7b   : > { %1779 = vmatprep.subr.bf16.mxu0 %v1778_v39  ;;  %v1816_v11 = vpack.c.bf16 %v316_v10, %v313_v9  ;;  %v317_v12 = vld [vmem:[%s2312_s23] sm:$0xff]  ;;  %v323_v18 = vrot.slane %v318_v16, %v322_v15  ;;  %v327_v19 = vrot.slane %v318_v16, %v326_v17  ;;  %v331_v25 = vrot.slane %v318_v16, %v330_v20  ;;  %v480_v55 = vld [vmem:[#allocation7 + $0x20] sm:$0xff]  ;;  %v481_v56 = vld [vmem:[#allocation7 + $0x28] sm:$0xff]  ;;  %s1455_s23 = scalar_lea.sflag [#allocation4], %s2306_s14 }
  0x7c   : > { %v478_v50 = vld [vmem:[#allocation7 + $0x10] sm:$0xff]  ;;  %v479_v51 = vld [vmem:[#allocation7 + $0x18] sm:$0xff]  ;;  %v1819_v58 = vpack.c.bf16 %v481_v56, %v480_v55 }
  0x7d   : > { %1805 = vmatpush3.bf16.msra.mxu1 %v1804_v44  ;;  %v483_v59 = vld [vmem:[#allocation7 + $0x38] sm:$0xff] }
  0x7e   : > { %1781 = vmatpush1.bf16.msra.mxu0 %v1780_v45  ;;  %1806 = vmatprep.subr.bf16.mxu1 %v2100_v0 }
  0x7f   : > { %1783 = vmatprep.subr.bf16.mxu0 %v1782_v48  ;;  %v477_v48 = vld [vmem:[#allocation7 + $0x8] sm:$0xff] }
  0x80   : > { %v1825_v49 = vpack.c.bf16 %v477_v48, %v476_v47  ;;  %v488_v47 = vld [vmem:[#allocation7 + $0x60] sm:$0xff]  ;;  %v489_v48 = vld [vmem:[#allocation7 + $0x68] sm:$0xff] }
  0x81   : > { %1808 = vmatpush3.bf16.msra.mxu1 %v1807_v53 }
  0x82   : > { %1785 = vmatpush1.bf16.msra.mxu0 %v1784_v54  ;;  %1809 = vmatprep.subr.bf16.mxu1 %v2100_v0  ;;  %v1828_v54 = vpack.c.bf16 %v479_v51, %v478_v50 }
  0x83   : > { %1787 = vmatprep.subr.bf16.mxu0 %v1786_v57  ;;  %v482_v57 = vld [vmem:[#allocation7 + $0x30] sm:$0xff] }
  0x84   : > { %v1822_v60 = vpack.c.bf16 %v483_v59, %v482_v57 }
  0x85   : > { %1811 = vmatpush3.bf16.msra.mxu1 %v1810_v62 }
  0x86   : > { %1789 = vmatpush1.bf16.msra.mxu0 %v1788_v63  ;;  %1812 = vmatprep.subr.bf16.mxu1 %v2100_v0 }
  0x87   : > { %1791 = vmatprep.subr.bf16.mxu0 %v1790_v4 }
  0x89   : > { %1814 = vmatpush3.bf16.msra.mxu1 %v1813_v7 }
  0x8a   : > { %1793 = vmatpush1.bf16.msra.mxu0 %v1792_v8  ;;  %1815 = vmatprep.subr.bf16.mxu1 %v2100_v0 }
  0x8b   : > { %1688 = vmatprep.subr.mxu0 %v2101_v1 }
  0x8d   : > { %400 = vmatmul.mubr.f32.vlgmr.msra.gmra.mrb[0].mxu0 %v317_v12  ;;  %1817 = vmatpush3.bf16.msra.mxu1 %v1816_v11 }
  0x8e   : > { %1678 = vmatprep.subr.mxu1 %v2101_v1  ;;  %1690 = vmatprep.mubr.msk.f32.mxu0 %vm2102_vm0, %v2101_v1 }
  0x90   : > { %1676 = vmatmul.mubr.f32.vlgmr.msra.gmra.mrb[0].mxu1 %v317_v12 }
  0x91   : > { %1680 = vmatprep.mubr.msk.f32.mxu1 %vm2102_vm0, %v2101_v1 }
 0x160   : > { %v401_v21 = vpop.f32.mrb[0].mxu0 }
 0x161   : > { %v402_v22 = vadd.f32 %v401_v21, %v323_v18  ;;  %v403_v23 = vpop.f32.mrb[1].mxu0 }
 0x162   : > { %v2343_v24 = vadd.f32 %v403_v23, %v327_v19 }
 0x163   : > { %v472_v26 = vpop.f32.mrb[0].mxu1  ;;  %v492_v28 = vmul.f32 0.17677669, %v402_v22 }
 0x164   : > { %657 = vrot.lane.b32.xlu0 %v2343_v24, %s2103_s10  ;;  %1679 = vmatpush3.xpose.msk.msra.mxu1 %vm493_vm1, %v2343_v24  ;;  %v1677_v27 = vpop.f32.mrb[1].mxu1  ;;  %v2349_v29 = vadd.f32 %v472_v26, %v331_v25 }
 0x165   : > { %1683 = vmatprep.subr.mxu1 %v2101_v1 }
 0x167   : > { %1681 = vmatmul.mubr.msk.f32.vlgmr.msra.gmra.mrb[2].mxu1 %vm493_vm1, %v492_v28 }
 0x168   : > { %655 = vrot.lane.b32.xlu0 %v492_v28, %s2103_s10  ;;  %1684 = vmatpush3.msra.mxu1 %v2349_v29 }
 0x169   : > { %1685 = vmatprep.mubr.msk.f32.mxu1 %vm2102_vm0, %v2101_v1  ;;  %1693 = vmatprep.subr.mxu1 %v2101_v1 }
 0x16c   : > { %744 = vrot.lane.b32.xlu0 %v2349_v29, %s2103_s10 }
 0x170   : > { %969 = vrot.lane.b32.xlu0 %v2343_v24, %s2104_s28 }
 0x1d6   : > { %v658_v30 = vpop.permute.xlu0 %657 }
 0x1d7   : > { %1689 = vmatpush3.xpose.msk.msra.mxu0 %vm493_vm1, %v658_v30 }
 0x1d8   : > { %1818 = vmatprep.subr.bf16.mxu0 %v2100_v0 }
 0x1da   : > { %v656_v31 = vpop.permute.xlu0 %655 }
 0x1db   : > { %1691 = vmatmul.mubr.msk.f32.vlgmr.msra.gmra.mrb[2].mxu0 %vm493_vm1, %v656_v31  ;;  %v486_v31 = vld [vmem:[#allocation7 + $0x50] sm:$0xff] }
 0x1dc   : > { %1706 = vmatprep.mubr.msk.f32.mxu0 %vm2102_vm0, %v2101_v1  ;;  %1820 = vmatpush3.bf16.msra.mxu0 %v1819_v58 }
 0x1dd   : > { %1821 = vmatprep.subr.bf16.mxu0 %v2100_v0 }
 0x1de   : > { %v745_v42 = vpop.permute.xlu0 %744 }
 0x1e0   : > { %1823 = vmatpush3.bf16.msra.mxu0 %v1822_v60  ;;  %v1585_v60 = vld [vmem:[%s2476_s4] ss:$0 sm:$0xff] }
 0x1e1   : > { %1720 = vmatprep.subr.mxu0 %v2101_v1 }
 0x1e2   : > { %v970_v61 = vpop.permute.xlu0 %969 }
 0x23a   : > { %v566_v32 = vpop.f32.mrb[2].mxu1 }
 0x23b   : > { %v1682_v33 = vpop.f32.mrb[3].mxu1  ;;  %v571_v34 = vsel %vm570_vm2, %v566_v32, -inf }
 0x23c   : > { %572 = vmax.xlane.f32.xlu1 %v571_v34 }
 0x2ae   : > { %v729_v35 = vpop.f32.mrb[2].mxu0 }
 0x2af   : > { %v1692_v36 = vpop.f32.mrb[3].mxu0  ;;  %v733_v37 = vsel %vm570_vm2, %v729_v35, -inf }
 0x2b0   : > { %734 = vmax.xlane.f32.xlu1 %v733_v37 }
 0x2c9   : > { %v573_v38 = vpop.xlane.xlu1 %572 }
 0x2ca   : > { %v574_v39 = vsub.f32 %v566_v32, %v573_v38  ;;  %v487_v32 = vld [vmem:[#allocation7 + $0x58] sm:$0xff] }
 0x2cb   : > { %v1834_v33 = vpack.c.bf16 %v487_v32, %v486_v31 }
 0x2cc   : > { %v575_v40 = vmul.f32 1.442695, %v574_v39 }
 0x2ce   : > { %1919 = vpow2.f32 %v575_v40 }
 0x2d8   : > { %v1920_v41 = vpop.eup %1919 }
 0x2d9   : > { %1686 = vmatmul.mubr.msk.f32.vlgmr.msra.gmra.mrb[4].mxu1 %vm570_vm2, %v1920_v41  ;;  %v577_v43 = vsel %vm570_vm2, %v1920_v41, 0.0 }
 0x2da   : > { %578 = vadd.xlane.f32.xlu0 %v577_v43  ;;  %1694 = vmatpush3.msra.mxu1 %v745_v42 }
 0x2db   : > { %1695 = vmatprep.mubr.msk.f32.mxu1 %vm2102_vm0, %v2101_v1  ;;  %1824 = vmatprep.subr.bf16.mxu1 %v2100_v0 }
 0x2f0   : > { %1055 = vrot.lane.b32.xlu0 %v2349_v29, %s2104_s28 }
 0x2f4   : > { %1206 = vrot.lane.b32.xlu0 %v492_v28, %s2105_s12 }
 0x33d   : > { %v735_v44 = vpop.xlane.xlu1 %734 }
 0x33e   : > { %v736_v45 = vsub.f32 %v729_v35, %v735_v44 }
 0x340   : > { %v737_v46 = vmul.f32 1.442695, %v736_v45 }
 0x342   : > { %1921 = vpow2.f32 %v737_v46 }
 0x34c   : > { %v1922_v52 = vpop.eup %1921 }
 0x34d   : > { %1696 = vmatmul.mubr.msk.f32.vlgmr.msra.gmra.mrb[6].mxu1 %vm570_vm2, %v1922_v52  ;;  %v739_v53 = vsel %vm570_vm2, %v1922_v52, 0.0  ;;  %v490_v52 = vld [vmem:[#allocation7 + $0x70] sm:$0xff] }
 0x34e   : > { %740 = vadd.xlane.f32.xlu1 %v739_v53  ;;  %1826 = vmatpush3.bf16.msra.mxu1 %v1825_v49  ;;  %v1837_v49 = vpack.c.bf16 %v489_v48, %v488_v47  ;;  %v491_v53 = vld [vmem:[#allocation7 + $0x78] sm:$0xff] }
 0x34f   : > { %1827 = vmatprep.subr.bf16.mxu1 %v2100_v0  ;;  %1717 = vmatprep.mubr.msk.f32.mxu1 %vm2102_vm0, %v2101_v1 }
 0x352   : > { %1829 = vmatpush3.bf16.msra.mxu1 %v1828_v54  ;;  %v1840_v54 = vpack.c.bf16 %v491_v53, %v490_v52 }
 0x353   : > { %1725 = vmatprep.subr.mxu1 %v2101_v1 }
 0x35f   : > { %967 = vrot.lane.b32.xlu1 %v492_v28, %s2104_s28  ;;  %v484_v28 = vld [vmem:[#allocation7 + $0x40] sm:$0xff] }
 0x367   : > { %v579_v62 = vpop.xlane.xlu0 %578 }
 0x368   : > { %1923 = vrcp.f32 %v579_v62 }
 0x36b   : > { %v1056_v5 = vpop.permute.xlu0 %1055 }
 0x372   : > { %v1924_v63 = vpop.eup %1923 }
 0x3ac   : > { %v650_v2 = vpop.f32.mrb[4].mxu1 }
 0x3ad   : > { %v654_v3 = vmul.f32 %v1924_v63, %v650_v2  ;;  %v1687_v4 = vpop.f32.mrb[5].mxu1 }
 0x3af   : > { %1718 = vmatmul.mubr.msk.f32.vlgmr.msra.gmra.mrb[8].mxu1 %vm493_vm1, %v654_v3 }
 0x3b0   : > { %1726 = vmatpush3.msra.mxu1 %v1056_v5  ;;  %1727 = vmatprep.mubr.msk.f32.mxu1 %vm2102_vm0, %v2101_v1 }
 0x3b1   : > { %1741 = vmatprep.subr.mxu1 %v2101_v1 }
 0x3db   : > { %v741_v6 = vpop.xlane.xlu1 %740 }
 0x3dc   : > { %1925 = vrcp.f32 %v741_v6 }
 0x3df   : > { %v968_v11 = vpop.permute.xlu1 %967 }
 0x3e6   : > { %v1926_v7 = vpop.eup %1925 }
 0x420   : > { %v816_v8 = vpop.f32.mrb[6].mxu1 }
 0x421   : > { %v820_v9 = vmul.f32 %v1926_v7, %v816_v8  ;;  %v1697_v10 = vpop.f32.mrb[7].mxu1 }
 0x423   : > { %1707 = vmatmul.mubr.msk.f32.vlgmr.msra.gmra.mrb[4].mxu0 %vm493_vm1, %v820_v9 }
 0x424   : > { %1721 = vmatpush3.xpose.msk.msra.mxu0 %vm493_vm1, %v970_v61  ;;  %1722 = vmatprep.mubr.msk.f32.mxu0 %vm2102_vm0, %v2101_v1 }
 0x425   : > { %1830 = vmatprep.subr.bf16.mxu0 %v2100_v0 }
 0x427   : > { %1723 = vmatmul.mubr.msk.f32.vlgmr.msra.gmra.mrb[6].mxu0 %vm493_vm1, %v968_v11 }
 0x428   : > { %1738 = vmatprep.mubr.msk.f32.mxu0 %vm2102_vm0, %v2101_v1 }
 0x482   : > { %v963_v12 = vpop.f32.mrb[8].mxu1 }
 0x483   : > { %v1719_v13 = vpop.f32.mrb[9].mxu1 }
 0x4f6   : > { %v890_v14 = vpop.f32.mrb[4].mxu0 }
 0x4f7   : > { %v964_v15 = vadd.f32 %v963_v12, %v890_v14  ;;  %v1708_v16 = vpop.f32.mrb[5].mxu0 }
 0x4fa   : > { %v1041_v17 = vpop.f32.mrb[6].mxu0 }
 0x4fb   : > { %v1724_v18 = vpop.f32.mrb[7].mxu0  ;;  %v1045_v19 = vsel %vm570_vm2, %v1041_v17, -inf }
 0x4fc   : > { %1046 = vmax.xlane.f32.xlu1 %v1045_v19 }
 0x50d   : > { %1208 = vrot.lane.b32.xlu1 %v2343_v24, %s2105_s12  ;;  %v1207_v24 = vpop.permute.xlu0 %1206 }
 0x511   : > { %1294 = vrot.lane.b32.xlu1 %v2349_v29, %s2105_s12  ;;  %v485_v29 = vld [vmem:[#allocation7 + $0x48] sm:$0xff] }
 0x512   : > { %v1831_v30 = vpack.c.bf16 %v485_v29, %v484_v28 }
 0x514   : > { %1832 = vmatpush3.bf16.msra.mxu0 %v1831_v30 }
 0x515   : > { %1833 = vmatprep.subr.bf16.mxu0 %v2100_v0 }
 0x518   : > { %1835 = vmatpush3.bf16.msra.mxu0 %v1834_v33 }
 0x519   : > { %1836 = vmatprep.subr.bf16.mxu0 %v2100_v0 }
 0x589   : > { %v1047_v20 = vpop.xlane.xlu1 %1046 }
 0x58a   : > { %v1048_v21 = vsub.f32 %v1041_v17, %v1047_v20 }
 0x58c   : > { %v1049_v22 = vmul.f32 1.442695, %v1048_v21 }
 0x58d   : > { %v1209_v23 = vpop.permute.xlu1 %1208 }
 0x58e   : > { %1927 = vpow2.f32 %v1049_v22 }
 0x591   : > { %v1295_v27 = vpop.permute.xlu1 %1294 }
 0x598   : > { %v1928_v25 = vpop.eup %1927 }
 0x599   : > { %1728 = vmatmul.mubr.msk.f32.vlgmr.msra.gmra.mrb[10].mxu1 %vm570_vm2, %v1928_v25  ;;  %v1051_v26 = vsel %vm570_vm2, %v1928_v25, 0.0 }
 0x59a   : > { %1742 = vmatpush3.xpose.msk.msra.mxu1 %vm493_vm1, %v1209_v23  ;;  %1052 = vadd.xlane.f32.xlu1 %v1051_v26 }
 0x59b   : > { %1743 = vmatprep.mubr.msk.f32.mxu1 %vm2102_vm0, %v2101_v1  ;;  %1746 = vmatprep.subr.mxu1 %v2101_v1 }
 0x59d   : > { %1744 = vmatmul.mubr.msk.f32.vlgmr.msra.gmra.mrb[12].mxu1 %vm493_vm1, %v1207_v24 }
 0x59e   : > { %1747 = vmatpush3.msra.mxu1 %v1295_v27  ;;  %1748 = vmatprep.mubr.msk.f32.mxu1 %vm2102_vm0, %v2101_v1 }
 0x627   : > { %v1053_v34 = vpop.xlane.xlu1 %1052 }
 0x628   : > { %1929 = vrcp.f32 %v1053_v34 }
 0x632   : > { %v1930_v35 = vpop.eup %1929 }
 0x66c   : > { %v1127_v36 = vpop.f32.mrb[10].mxu1 }
 0x66d   : > { %v1131_v37 = vmul.f32 %v1930_v35, %v1127_v36  ;;  %v1729_v38 = vpop.f32.mrb[11].mxu1 }
 0x66f   : > { %1739 = vmatmul.mubr.msk.f32.vlgmr.msra.gmra.mrb[8].mxu0 %vm493_vm1, %v1131_v37 }
 0x670   : > { %v1280_v39 = vpop.f32.mrb[12].mxu1  ;;  %1759 = vmatprep.mubr.msk.f32.mxu0 %vm2102_vm0, %v2101_v1  ;;  %1838 = vmatpush3.bf16.msra.mxu0 %v1837_v49 }
 0x671   : > { %v1745_v40 = vpop.f32.mrb[13].mxu1  ;;  %v1284_v41 = vsel %vm570_vm2, %v1280_v39, -inf  ;;  %1839 = vmatprep.subr.bf16.mxu0 %v2100_v0 }
 0x672   : > { %1285 = vmax.xlane.f32.xlu0 %v1284_v41 }
 0x674   : > { %1841 = vmatpush3.bf16.msra.mxu0 %v1840_v54 }
 0x6ff   : > { %v1286_v42 = vpop.xlane.xlu0 %1285 }
 0x700   : > { %v1287_v43 = vsub.f32 %v1280_v39, %v1286_v42 }
 0x702   : > { %v1288_v44 = vmul.f32 1.442695, %v1287_v43 }
 0x704   : > { %1931 = vpow2.f32 %v1288_v44 }
 0x70e   : > { %v1932_v45 = vpop.eup %1931 }
 0x70f   : > { %1749 = vmatmul.mubr.msk.f32.vlgmr.msra.gmra.mrb[14].mxu1 %vm570_vm2, %v1932_v45  ;;  %v1290_v46 = vsel %vm570_vm2, %v1932_v45, 0.0 }
 0x710   : > { %1291 = vadd.xlane.f32.xlu0 %v1290_v46 }
 0x742   : > { %v1201_v1 = vpop.f32.mrb[8].mxu0 }
 0x743   : > { %v1205_v50 = vadd.f32 %v1201_v1, %v964_v15  ;;  %v1740_v51 = vpop.f32.mrb[9].mxu0 }
 0x79d   : > { %v1292_v55 = vpop.xlane.xlu0 %1291 }
 0x79e   : > { %1933 = vrcp.f32 %v1292_v55 }
 0x7a8   : > { %v1934_v56 = vpop.eup %1933 }
 0x7e2   : > { %v1366_v57 = vpop.f32.mrb[14].mxu1 }
 0x7e3   : > { %v1370_v58 = vmul.f32 %v1934_v56, %v1366_v57  ;;  %v1750_v59 = vpop.f32.mrb[15].mxu1 }
 0x7e5   : > { %1760 = vmatmul.mubr.msk.f32.vlgmr.msra.gmra.mrb[10].mxu0 %vm493_vm1, %v1370_v58 }
 0x8b8   : > { %v1440_v0 = vpop.f32.mrb[10].mxu0 }
 0x8b9   : > { %v1444_v61 = vadd.f32 %v1440_v0, %v1205_v50  ;;  %v1761_v62 = vpop.f32.mrb[11].mxu0 }
 0x8bb   : > { %v1452_v63 = vadd.f32 %v1585_v60, %v1444_v61 }
 0x8bd   : > { %1453 = vst [vmem:[%s268_s29] sm:$0xff] %v1452_v63 }
 0x8be   : > { %2034 = shalt.err (!%p2031_p2)
}
 0x8bf   : > { %s2035_s14 = scalar_lea.hbm %s2428_s17, 128  ;;  %s2039_s12 = scalar_lea.hbm %s2477_s5, 256 }
 0x8c0   : > { %p2036_p13 = scmp.ne.s32.totalorder %s2428_s17, %s2035_s14  ;;  %p2040_p4 = scmp.lt.u32.totalorder %s2428_s17, %s2477_s5 }
 0x8c1   : > { %p2041_p7 = scmp.lt.u32.totalorder %s2039_s12, %s2035_s14  ;;  %p2043_p11 = scmp.lt.u32.totalorder %s2035_s14, %s2428_s17 }
 0x8c2   : > { %p2037_p6 = pnand %p2036_p13, %p2491_p0 }
 0x8c3   : > { %p2042_p8 = por %p2041_p7, %p2040_p4 }
 0x8c4   : > { %p2038_p10 = pneg %p2037_p6 }
 0x8c5   : > { %p2044_p1 = por %p2043_p11, %p2042_p8 }
 0x8c7   : > { %p2045_p3 = pnand %p2044_p1, %p2038_p10 }
 0x8c9   : > { %2048 = shalt.err (!%p2045_p3)
}
 0x8ca   : > { %1852 = dma.vmem_to_hbm [thread:$0]  (%p2491_p0), %s2430_s8, 128, %s2428_s17, %s1455_s23  }
 0x8cb PF: > { %s1480_s6 = sand.u32 1, %s2079_s18   ;;  %p2492_p5 = scmp.ne.s32.totalorder %s2482_s25, 0 }
 0x8cc   : > { %p2493_p9 = scmp.ge.s32.totalorder %s2091_s21, 2  ;;  %s1481_s29 = scalar_lea.sflag [#allocation4], %s1480_s6 }
 0x8ce   : > { %p1866_p12 = pnand %p2493_p9, %p2492_p5 }
 0x8d0   : > { %2074 = dma.done.wait (!%p1866_p12), %s1481_s29, 128  }
 0x8d1   : > { %2076 = vsyncadd (!%p1866_p12), %s1481_s29, 4294967168  ;;  %p19_p2 = scmp.ge.s32.totalorder %s2247_s16, 4   ;;  %s2494_s18 = smov %s2083_s19 }
 0x8d2   : > { %s2495_s19 = smov %s2087_s20  ;;  %s2496_s20 = smov %s2256_s27 }
 0x8d3   : > { %s2497_s21 = smov %s2247_s16  ;;  %21 = sbr.rel (!%p19_p2) target bundleno = 6 (0x6), region = 93 }
 0x8da   :  { %1486 = vsyncpa [#allocation3], 1 }
 0x8db   :  { %1488 = vsyncpa [#allocation3 + $0x1], 1 }
 0x8dc   :  { %1489 = vsyncpa [#allocation6], 1 }
 0x8dd   :  { %1490 = vsyncpa [#allocation4], 1 }
 0x8de   :  { %1492 = vsyncpa [#allocation4 + $0x1], 1 }

</bundles_post_ra>
